<compile_context>
chip_gen: v5e
topology: v5e:2x2
jax: 0.10.0
libtpu: 0.0.40
codegen_flags: <defaults>
</compile_context>

<pallas_src>
import math
from functools import partial

import jax
import jax.numpy as jnp
import numpy as np
from jax.experimental import pallas as pl
from jax.experimental.pallas import tpu as pltpu

LRELU_SLOPE = 0.2
BN_EPS = 1e-5


def _round_up(a, b):
    return (a + b - 1) // b * b


def _vmem_capacity_bytes():
    """Device VMEM capacity with a v7x-safe fallback (64 MiB per TensorCore)."""
    try:
        info = pltpu.get_tpu_info()
        cap = getattr(info, "vmem_capacity_bytes", None)
        if cap:
            return int(cap)
    except Exception:
        pass
    return 64 * 1024 * 1024


def _pick_tile_rows(m_fold, k_cols, ncol, in_bytes, out_bytes, budget_bytes, cap=4096):
    """Largest multiple-of-8 row tile whose double-buffered in+out footprint fits."""
    per_row = 2 * (k_cols * in_bytes + ncol * out_bytes)  # double-buffered in + out
    t = budget_bytes // max(per_row, 1)
    t = min(int(t), cap, _round_up(m_fold, 8))
    return max(8, (t // 8) * 8)


# ---------------------------------------------------------------------------
# Pass 1: x sufficient statistics (per-column sum + Gram), parallel partials.
# ---------------------------------------------------------------------------
def _stats_kernel(xf_ref, s_ref, g_ref):
    xb = xf_ref[...]                       # (tile_rows, K) bf16
    xs = xb.astype(jnp.float32)
    s_ref[...] = jnp.sum(xs, axis=0)[None, None, :]
    # Gram = x^T x, contracting the (large) row axis; f32 MXU accumulation.
    g_ref[...] = jax.lax.dot_general(
        xb, xb, (((0,), (0,)), ((), ())),
        preferred_element_type=jnp.float32)[None, :, :]


# ---------------------------------------------------------------------------
# Pass 2: x @ W' + b' -> LeakyReLU(0.2)  (BN already folded into W', b').
# ---------------------------------------------------------------------------
def _apply_kernel(xf_ref, wf_ref, bf_ref, o_ref):
    y = jnp.dot(xf_ref[...], wf_ref[...], preferred_element_type=jnp.float32)
    y = y + bf_ref[...]
    o_ref[...] = jnp.where(y >= 0, y, LRELU_SLOPE * y).astype(o_ref.dtype)


def deconv_block_forward(x, weight, bias, gamma, beta, *, tile_rows=None,
                         compute_dtype=jnp.bfloat16):
    """x: (N, Cin, H, W) NCHW; weight: (Cin, Cout, kH, kW) (PyTorch ConvTranspose2d)."""
    n, cin, h, w = x.shape
    cin_w, cout, kh, kw = weight.shape
    assert cin_w == cin
    assert kh == 2 and kw == 2, "DeconvBlock defaults: kernel_size=2, stride=2, padding=0"
    k2 = kh * kw
    m = n * h * w
    f32 = jnp.float32
    out_dtype = x.dtype

    # ---- fold so the kernel output width is an exact multiple of 128 lanes ----
    base = k2 * cout
    fold = 1 if base >= 128 else (128 // math.gcd(base, 128))
    k_cols = fold * cin
    ncol = _round_up(fold * base, 128)

    in_bytes = jnp.dtype(compute_dtype).itemsize
    out_bytes = jnp.dtype(out_dtype).itemsize

    # ---- VMEM-aware tile sizing + explicit scoped-VMEM limit --------------------
    vmem_limit = int(min(max(_vmem_capacity_bytes() // 2, 16 * 1024 * 1024),
                         96 * 1024 * 1024))
    m_fold = pl.cdiv(m, fold)
    if tile_rows is None:
        tile_rows = _pick_tile_rows(m_fold, k_cols, ncol, in_bytes, out_bytes,
                                    vmem_limit // 2)
    tile_rows = max(8, (int(tile_rows) // 8) * 8)
    steps = pl.cdiv(m_fold, tile_rows)
    m_fold_pad = steps * tile_rows
    m_pix_pad = m_fold_pad * fold

    # ---- fold x: NCHW -> (pixels, Cin) -> zero-pad -> (m_fold_pad, fold*Cin) ----
    # Zero-padded rows are exact no-ops for the x statistics and are sliced off the
    # apply output, so cdiv-padding is always safe.
    # TODO(synk): the NCHW<->flattened transposes are extra (small) HBM passes; a
    # production integration should keep NHWC end-to-end.
    x2 = jnp.transpose(x, (0, 2, 3, 1)).reshape(m, cin)
    x2 = jnp.pad(x2, ((0, m_pix_pad - m), (0, 0)))
    xf = x2.reshape(m_fold_pad, k_cols).astype(compute_dtype)

    row_spec = pl.BlockSpec((tile_rows, k_cols), lambda i: (i, 0))

    # ---- Pass 1: sufficient statistics (parallel per-tile partials) -------------
    stats_cost = pl.CostEstimate(
        flops=int(2 * m_fold_pad * k_cols * k_cols + m_fold_pad * k_cols),
        transcendentals=0,
        bytes_accessed=int(m_fold_pad * k_cols * in_bytes
                           + steps * (k_cols + k_cols * k_cols) * 4))
    s_part, g_part = pl.pallas_call(
        _stats_kernel,
        grid=(steps,),
        in_specs=[row_spec],
        out_specs=(pl.BlockSpec((1, 1, k_cols), lambda i: (i, 0, 0)),
                   pl.BlockSpec((1, k_cols, k_cols), lambda i: (i, 0, 0))),
        out_shape=(jax.ShapeDtypeStruct((steps, 1, k_cols), f32),
                   jax.ShapeDtypeStruct((steps, k_cols, k_cols), f32)),
        compiler_params=pltpu.CompilerParams(
            dimension_semantics=("parallel",),
            vmem_limit_bytes=vmem_limit),
        cost_estimate=stats_cost,
    )(xf)

    # ---- finalize BN statistics analytically (tiny, XLA) ------------------------
    s_f = jnp.sum(s_part, axis=0).reshape(fold, cin).sum(axis=0)            # (Cin,)
    g_f = jnp.sum(g_part, axis=0).reshape(fold, cin, fold, cin)
    idx = jnp.arange(fold)
    gram = g_f[idx, :, idx, :].sum(axis=0)                                  # (Cin, Cin)

    w2 = jnp.transpose(weight, (0, 2, 3, 1)).reshape(cin, base).astype(f32)
    bias_f = bias.astype(f32)
    gamma_f = gamma.astype(f32)
    beta_f = beta.astype(f32)

    t_base = s_f @ w2                                   # (base,)  sum_p x.w_col
    q_base = jnp.sum(w2 * (gram @ w2), axis=0)          # (base,)  w_col^T G w_col
    t_c = t_base.reshape(k2, cout).sum(axis=0)
    q_c = q_base.reshape(k2, cout).sum(axis=0)
    count = float(m * k2)
    mean = t_c / count + bias_f
    ss = q_c + 2.0 * bias_f * t_c + count * bias_f * bias_f
    # TODO(synk): E[y^2] - E[y]^2 is cancellation-prone when |mean| >> std; use a
    # shifted / compensated form for production scale.
    var = jnp.maximum(ss / count - mean * mean, 0.0)
    scale = gamma_f * jax.lax.rsqrt(var + BN_EPS)

    # ---- fold BN into the apply matmul: W' = W*scale(col), b' = (b-mean)*scale+beta
    scale_cols = jnp.tile(scale, k2)                                        # (base,)
    w2s = w2 * scale_cols[None, :]
    wf = jnp.kron(jnp.eye(fold, dtype=f32), w2s)                            # (K, fold*base)
    wf = jnp.pad(wf, ((0, 0), (0, ncol - fold * base))).astype(compute_dtype)
    bprime = jnp.tile(jnp.tile((bias_f - mean) * scale + beta_f, k2), fold)
    bprime = jnp.pad(bprime, (0, ncol - fold * base))[None, :].astype(f32)  # (1, ncol)

    # ---- Pass 2: matmul + LeakyReLU, lane-dense output, parallel over M tiles ---
    apply_cost = pl.CostEstimate(
        flops=int(2 * m_fold_pad * k_cols * ncol),
        transcendentals=0,
        bytes_accessed=int(m_fold_pad * k_cols * in_bytes + k_cols * ncol * in_bytes
                           + ncol * 4 + m_fold_pad * ncol * out_bytes))
    out_fold = pl.pallas_call(
        _apply_kernel,
        grid=(steps,),
        in_specs=[row_spec,
                  pl.BlockSpec((k_cols, ncol), lambda i: (0, 0)),
                  pl.BlockSpec((1, ncol), lambda i: (0, 0))],
        out_specs=pl.BlockSpec((tile_rows, ncol), lambda i: (i, 0)),
        out_shape=jax.ShapeDtypeStruct((m_fold_pad, ncol), out_dtype),
        compiler_params=pltpu.CompilerParams(
            dimension_semantics=("parallel",),      # megacore-shardable on v7x
            vmem_limit_bytes=vmem_limit),
        cost_estimate=apply_cost,
    )(xf, wf, bprime)

    # ---- un-fold (free, row-major) and interleave back to NCHW ------------------
    # TODO(synk): this transpose is an extra HBM pass over the largest tensor; fuse
    # it into out_specs (or keep NHWC end-to-end) in a production integration.
    out = out_fold[:, :fold * base].reshape(m_pix_pad, base)[:m]
    out = out.reshape(n, h, w, kh, kw, cout)
    out = jnp.transpose(out, (0, 5, 1, 3, 2, 4)).reshape(n, cout, h * kh, w * kw)
    return out


def reference_forward(x, weight, bias, gamma, beta):
    """Pure-JAX f32 reference with identical semantics (correctness check)."""
    n, cin, h, w = x.shape
    _, cout, kh, kw = weight.shape
    y = jnp.einsum('nchw,cokl->nohkwl', x, weight).reshape(n, cout, h * kh, w * kw)
    y = y + bias[None, :, None, None]
    mean = jnp.mean(y, axis=(0, 2, 3), keepdims=True)
    var = jnp.mean((y - mean) ** 2, axis=(0, 2, 3), keepdims=True)
    yn = (y - mean) * jax.lax.rsqrt(var + BN_EPS)
    yn = yn * gamma[None, :, None, None] + beta[None, :, None, None]
    return jnp.where(yn >= 0, yn, LRELU_SLOPE * yn)


if __name__ == "__main__":
    key = jax.random.PRNGKey(0)
    k_x, k_w, k_b, k_g, k_be = jax.random.split(key, 5)

    N, CIN, COUT, H, W = 2, 4, 8, 16, 16

    x = jax.random.normal(k_x, (N, CIN, H, W), dtype=jnp.float32)
    # ConvTranspose2d params (PyTorch shape: (in_channels, out_channels, kH, kW))
    weight = jax.random.normal(k_w, (CIN, COUT, 2, 2), dtype=jnp.float32) * 0.2
    bias = jax.random.normal(k_b, (COUT,), dtype=jnp.float32) * 0.1
    # BatchNorm2d affine params
    gamma = 1.0 + 0.1 * jax.random.normal(k_g, (COUT,), dtype=jnp.float32)
    beta = 0.1 * jax.random.normal(k_be, (COUT,), dtype=jnp.float32)

    # tile_rows=32 -> 4 grid steps at this small demo size (exercises multi-step
    # pipelining in both passes); real shapes auto-pick VMEM-budgeted tiles.
    out = deconv_block_forward(x, weight, bias, gamma, beta, tile_rows=32)
    out = jax.block_until_ready(out)

    ref = jax.block_until_ready(reference_forward(x, weight, bias, gamma, beta))
    assert out.shape == (N, COUT, 2 * H, 2 * W), out.shape
    # bf16 matmul operands (f32 accumulation) -> bf16-appropriate tolerance.
    np.testing.assert_allclose(np.asarray(out, dtype=np.float32), np.asarray(ref),
                               rtol=3e-2, atol=3e-2)

    # TODO(synk): BatchNorm running-stat updates are a training side effect and not
    # part of the forward output; intentionally not reproduced here.
    print("KERNEL_OK")
</pallas_src>

<mosaic_0001>
module attributes {stable_mosaic.version = 11 : i64} {
  func.func @_stats_kernel(%arg0: i32, %arg1: memref<32x16xbf16, #tpu.memory_space<vmem>>, %arg2: memref<1x1x16xf32, #tpu.memory_space<vmem>>, %arg3: memref<1x16x16xf32, #tpu.memory_space<vmem>>) attributes {dimension_semantics = [#tpu.dimension_semantics<parallel>], iteration_bounds = array<i64: 4>, scalar_prefetch = 0 : i64, scratch_operands = 0 : i64, tpu.core_type = #tpu.core_type<tc>, window_params = [{transform_indices = @transform_0, window_bounds = array<i64: 32, 16>}, {transform_indices = @transform_1, window_bounds = array<i64: 1, 1, 16>}, {transform_indices = @transform_2, window_bounds = array<i64: 1, 16, 16>}]} {
    %c0 = arith.constant 0 : index
    %c0_0 = arith.constant 0 : index
    %0 = vector.load %arg1[%c0, %c0_0] : memref<32x16xbf16, #tpu.memory_space<vmem>>, vector<32x16xbf16>
    %1 = arith.extf %0 : vector<32x16xbf16> to vector<32x16xf32>
    %cst = arith.constant dense<0.000000e+00> : vector<16xf32>
    %2 = vector.multi_reduction <add>, %1, %cst [0] : vector<32x16xf32> to vector<16xf32>
    %3 = vector.shape_cast %2 : vector<16xf32> to vector<1x1x16xf32>
    %c0_1 = arith.constant 0 : index
    %c0_2 = arith.constant 0 : index
    %c0_3 = arith.constant 0 : index
    %4 = vector.load %arg2[%c0_1, %c0_2, %c0_3] : memref<1x1x16xf32, #tpu.memory_space<vmem>>, vector<1x1x16xf32>
    tpu.vector_store %arg2[%c0_1, %c0_2, %c0_3], %3 {strides = array<i32>} : memref<1x1x16xf32, #tpu.memory_space<vmem>>, vector<1x1x16xf32>,
    %cst_4 = arith.constant dense<0.000000e+00> : vector<16x16xf32>
    %5 = tpu.matmul %0, %0, %cst_4 {dimension_numbers = #tpu.dot_dimension_numbers<[0], [0], [1], [1], [0, 1, 1, 1], [], []>} : vector<32x16xbf16>, vector<32x16xbf16>, vector<16x16xf32> -> vector<16x16xf32>
    %6 = vector.shape_cast %5 : vector<16x16xf32> to vector<1x16x16xf32>
    %c0_5 = arith.constant 0 : index
    %c0_6 = arith.constant 0 : index
    %c0_7 = arith.constant 0 : index
    %7 = vector.load %arg3[%c0_5, %c0_6, %c0_7] : memref<1x16x16xf32, #tpu.memory_space<vmem>>, vector<1x16x16xf32>
    tpu.vector_store %arg3[%c0_5, %c0_6, %c0_7], %6 {strides = array<i32>} : memref<1x16x16xf32, #tpu.memory_space<vmem>>, vector<1x16x16xf32>,
    return
  }
  func.func @transform_0(%arg0: i32) -> (i32, i32) {
    %c0_i32 = arith.constant 0 : i32
    %c0_i32_0 = arith.constant 0 : i32
    return %arg0, %c0_i32 : i32, i32
  }
  func.func @transform_1(%arg0: i32) -> (i32, i32, i32) {
    %c0_i32 = arith.constant 0 : i32
    %c0_i32_0 = arith.constant 0 : i32
    %c0_i32_1 = arith.constant 0 : i32
    return %arg0, %c0_i32, %c0_i32_0 : i32, i32, i32
  }
  func.func @transform_2(%arg0: i32) -> (i32, i32, i32) {
    %c0_i32 = arith.constant 0 : i32
    %c0_i32_0 = arith.constant 0 : i32
    %c0_i32_1 = arith.constant 0 : i32
    return %arg0, %c0_i32, %c0_i32_0 : i32, i32, i32
  }
}

</mosaic_0001>

<bundles_post_ra>
// kernel: tpu_custom_call.1
= control target key start
LH: loop header
LB: loop body
LE: loop exit
PB: predicated region body
PF: predicated region fallthrough
CT: control target
= control target key end

     0   :  { %8 = vsyncpa [#allocation3], 0  ;;  %s644_s0 = inlined_call_operand.vmem [shape: bf16[128,16], index: 0, kind: input, shape index: {}]   ;;  %s645_s1 = inlined_call_operand.hbm [shape: f32[4,1,16], index: 1, kind: output, shape index: {0}]   ;;  %s646_s2 = inlined_call_operand.hbm [shape: f32[4,16,16], index: 2, kind: output, shape index: {1}]  }
   0x1   :  { %10 = vsyncpa [#allocation3 + $0x1], 0 }
   0x2   :  { %11 = vsyncpa [#allocation5], 0 }
   0x3   :  { %13 = vsyncpa [#allocation5 + $0x1], 0  ;;  %s534_s9 = smov 0   ;;  %s536_s10 = smov 0  }
   0x4   :  { %s538_s11 = smov 0   ;;  %s540_s12 = smov 0  }
   0x5 LB: > { %s555_s13 = sadd.s32 4294967295, %s515_s12   ;;  %s350_s14 = sadd.s32 4294967294, %s515_s12   ;;  %s515_s12 = sphi %s540_s12, %s652_s12   ;;  %s511_s11 = sphi %s538_s11, %s651_s11   ;;  %s507_s10 = sphi %s536_s10, %s650_s10   ;;  %s503_s9 = sphi %s534_s9, %s649_s9  }
   0x6   : > { %s559_s15 = sadd.s32 1, %s515_s12   ;;  %s52_s16 = sadd.s32 1, %s511_s11 }
   0x7   : > { %s49_s17 = ssub.s32 %s515_s12, %s559_s15  ;;  %p62_p0 = scmp.ne.s32.totalorder %s511_s11, %s507_s10 }
   0x8   : > { %p50_p1 = scmp.eq.s32.totalorder %s49_s17, 0  ;;  %p63_p2 = scmp.eq.s32.totalorder %s555_s13, 3 }
   0x9   : > { %p68_p3 = scmp.ne.s32.totalorder %s507_s10, %s503_s9  ;;  %p69_p4 = scmp.eq.s32.totalorder %s350_s14, 3 }
   0xa   : > { %s570_s18 = scalar_select %p50_p1, %s511_s11, %s52_s16  }
   0xb   : > { %p572_p5 = por %p63_p2, %p62_p0  ;;  %p576_p6 = por %p69_p4, %p68_p3 }
   0xc   : > { %p353_p7 = scmp.ge.s32.totalorder %s515_s12, 1  ;;  %p122_p8 = scmp.lt.s32.totalorder %s515_s12, 5 }
   0xe   : > { %p123_p9 = pnand %p353_p7, %p122_p8 }
   0xf   : > { %s355_s21 = sshll.u32 (!%p123_p9), %s555_s13, 2  ;;  %s591_s26 = sand.u32 (!%p123_p9), 1, %s507_s10  }
  0x10   : > { %126 = sbr.rel (%p123_p9) target bundleno = 336 (0x150), region = 24  ;;  %p149_p10 = scmp.lt.s32.totalorder (!%p123_p9), %s355_s21, 15 }
  0x11   : > { %s241_s29 = scalar_lea.hbm (!%p123_p9), %s645_s1, %s555_s13  ;;  %s140_s30 = scalar_lea.vmem (!%p123_p9), [#allocation2], %s591_s26 }
  0x12   : > { %s243_s3 = sshll.u32 (!%p123_p9), %s140_s30, 4  ;;  %s245_s4 = sshll.u32 (!%p123_p9), %s241_s29, 4  ;;  %s244_s3 = int_to_ptr.vmem [resolvable:$true] %s243_s3  ;;  %s246_s4 = int_to_ptr.hbm [resolvable:$true] %s245_s4 }
  0x13   : > { %s228_s5 = scalar_lea.sflag (!%p123_p9), [#allocation3], %s591_s26  ;;  %s435_s6 = sshra.s32 (!%p123_p9), %s246_s4, 4  ;;  %s436_s6 = int_to_ptr.hbm [resolvable:$true] %s435_s6 }
  0x14   : > { %s437_s7 = scalar_lea.hbm (!%p123_p9), %s436_s6, 1  ;;  %s441_s16 = scalar_lea.hbm (!%p123_p9), %s645_s1, 4 }
  0x15   : > { %s654_s21 = smov (!%p149_p10, %s355_s21), 15  ;;  %vm207_vm0 = vcmask 261120   ;;  %vm163_vm1 = vcmask 130048   ;;  %vm177_vm2 = vcmask 122880   ;;  %p438_p11 = scmp.ne.s32.totalorder %s436_s6, %s437_s7 }
  0x16   : > { %s356_s22 = sshll.u32 %s654_s21, 2  ;;  %p442_p0 = scmp.lt.s32.totalorder %s436_s6, %s645_s1 }
  0x17   : > { %s152_s25 = scalar_lea.vmem %s644_s0, %s356_s22  ;;  %p439_p12 = pnand %p438_p11, %p572_p5 }
  0x18   : > { %v371_v0 = vld [vmem:[%s152_s25] sm:$0xff]  ;;  %v372_v1 = vld [vmem:[%s152_s25 + $0x8] sm:$0xff]  ;;  %p443_p1 = scmp.lt.s32.totalorder %s441_s16, %s437_s7 }
  0x19   : > { %191 = vxpose.xlu0.c.b16.start [1/2] (short) (narrow) %v371_v0, 16  ;;  %217 = vmatpush.bf16.msra.mxu0 %v372_v1  ;;  %v155_v3 = vld [vmem:[%s152_s25] sm:$0xff]   ;;  %v157_v6 = vld [vmem:[%s152_s25 + $0x8] sm:$0xff]   ;;  %p440_p13 = pneg %p439_p12 }
  0x1a   : > { %v159_v4 = vunpack.c.l.bf16 %v155_v3  ;;  %v160_v5 = vunpack.c.h.bf16 %v155_v3  ;;  %v161_v7 = vunpack.c.l.bf16 %v157_v6  ;;  %v162_v11 = vunpack.c.h.bf16 %v157_v6  ;;  %p444_p2 = por %p443_p1, %p442_p0 }
  0x1c   : > { %v164_v8 = vsel %vm163_vm1, %v159_v4, 0.0  ;;  %v165_v9 = vsel %vm163_vm1, %v160_v5, 0.0  ;;  %v167_v12 = vsel %vm163_vm1, %v161_v7, 0.0  ;;  %v169_v14 = vsel %vm163_vm1, %v162_v11, 0.0  ;;  %p445_p3 = pnand %p444_p2, %p440_p13 }
  0x1d   : > { %218 = vmatpush.bf16.msra.mxu0 %v371_v0  ;;  %v166_v10 = vadd.f32 %v165_v9, %v164_v8 }
  0x1f   : > { %v168_v13 = vadd.f32 %v167_v12, %v166_v10 }
  0x21   : > { %v170_v15 = vadd.f32 %v169_v14, %v168_v13 }
  0x23   : > { %v171_v16 = vrot.slane %v170_v15, 4 }
  0x25   : > { %v172_v17 = vadd.f32 %v171_v16, %v170_v15 }
  0x27   : > { %v173_v18 = vrot.slane %v172_v17, 2 }
  0x29   : > { %192 = vxpose.xlu0.c.b16.end [2/2] (short) (narrow) %v372_v1, 16  ;;  %v174_v19 = vadd.f32 %v173_v18, %v172_v17 }
  0x2b   : > { %v175_v20 = vrot.slane %v174_v19, 1 }
  0x2d   : > { %v176_v21 = vadd.f32 %v175_v20, %v174_v19 }
  0x2f   : > { %178 = vst.msk [vmem:[%s140_s30] sm:$0x1] %vm177_vm2, %v176_v21 }
  0xc5   : > { %v199_v2 = vpop.trf.xlu0 }
  0xc6   : > { %365 = vmatmul.msk.bf16.vlgmr.msra.gmra.mxu0 %vm207_vm0, %v199_v2 }
  0xc7   : > { %448 = shalt.err (!%p445_p3)
}
  0xc8   : > { %374 = dma.vmem_to_hbm [thread:$0]  (%p572_p5), %s244_s3, 16, %s246_s4, %s228_s5  }
  0xc9   : > { %s354_s22 = sshll.u32 %s591_s26, 4  ;;  %s373_s23 = sshll.u32 %s555_s13, 4 }
  0xca   : > { %s147_s24 = scalar_lea.vmem [#allocation4], %s354_s22  ;;  %s256_s28 = scalar_lea.hbm %s646_s2, %s373_s23 }
  0xcb   : > { %s257_s29 = sshll.u32 %s147_s24, 4  ;;  %s259_s30 = sshll.u32 %s256_s28, 4  ;;  %s258_s29 = int_to_ptr.vmem [resolvable:$true] %s257_s29  ;;  %s260_s30 = int_to_ptr.hbm [resolvable:$true] %s259_s30 }
  0xcc   : > { %s232_s6 = scalar_lea.sflag [#allocation5], %s591_s26  ;;  %s463_s3 = sshra.s32 %s260_s30, 4  ;;  %s464_s3 = int_to_ptr.hbm [resolvable:$true] %s463_s3 }
  0xcd   : > { %s465_s13 = scalar_lea.hbm %s464_s3, 16  ;;  %s469_s7 = scalar_lea.hbm %s646_s2, 64 }
  0xce   : > { %p466_p4 = scmp.ne.s32.totalorder %s464_s3, %s465_s13  ;;  %p470_p9 = scmp.lt.s32.totalorder %s464_s3, %s646_s2 }
  0xcf   : > { %p471_p10 = scmp.lt.s32.totalorder %s469_s7, %s465_s13 }
  0xd0   : > { %p467_p7 = pnand %p466_p4, %p572_p5 }
  0xd1   : > { %p472_p11 = por %p471_p10, %p470_p9 }
  0xd2   : > { %p468_p8 = pneg %p467_p7 }
  0xd4   : > { %p473_p12 = pnand %p472_p11, %p468_p8 }
 0x143   : > { %v220_v22 = vpop.f32.mrf.mxu0 }
 0x144   : > { %225 = vst.msk [vmem:[%s147_s24] sm:$0xff] %vm163_vm1, %v220_v22 }
 0x14b   : > { %v222_v23 = vpop.f32.mrf.mxu0 }
 0x14c   : > { %226 = vst.msk [vmem:[%s147_s24 + $0x8] sm:$0xff] %vm163_vm1, %v222_v23 }
 0x14d   : > { %476 = shalt.err (!%p473_p12)
}
 0x14e   : > { %s517_s26 = smov 128   ;;  %s518_s16 = smov 8  }
 0x14f   : > { %375 = dma.vmem_to_hbm [thread:$0]  (%p572_p5), %s258_s29, 256, %s260_s30, %s232_s6, %s517_s26, %s517_s26, %s518_s16  }
 0x150 PF: > { %p385_p13 = scmp.ge.s32.totalorder %s515_s12, 2  ;;  %s274_s17 = sand.u32 1, %s503_s9  }
 0x151   : > { %s275_s21 = scalar_lea.sflag [#allocation3], %s274_s17 }
 0x152   : > { %p379_p0 = pnand %p385_p13, %p576_p6 }
 0x154   : > { %p380_p1 = pneg %p379_p0 }
 0x156   : > { %494 = dma.done.wait (%p380_p1), %s275_s21, 16  }
 0x157   : > { %496 = vsyncadd (%p380_p1), %s275_s21, 4294967280  ;;  %s284_s22 = scalar_lea.sflag [#allocation5], %s274_s17 }
 0x158   : > { %498 = dma.done.wait (%p380_p1), %s284_s22, 256  }
 0x159   : > { %500 = vsyncadd (%p380_p1), %s284_s22, 4294967040  ;;  %p16_p5 = scmp.ge.s32.totalorder %s559_s15, 6   ;;  %s649_s9 = smov %s507_s10 }
 0x15a   : > { %s650_s10 = smov %s511_s11  ;;  %s651_s11 = smov %s570_s18 }
 0x15b   : > { %s652_s12 = smov %s559_s15  ;;  %18 = sbr.rel (!%p16_p5) target bundleno = 5 (0x5), region = 76 }
 0x160   :  { %290 = vsyncpa [#allocation3], 1 }
 0x161   :  { %292 = vsyncpa [#allocation3 + $0x1], 1 }
 0x162   :  { %293 = vsyncpa [#allocation5], 1 }
 0x163   :  { %295 = vsyncpa [#allocation5 + $0x1], 1 }

</bundles_post_ra>
